<compile_context>
chip_gen: v5e
topology: v5e:2x2
jax: 0.10.0
libtpu: 0.0.40
codegen_flags: <defaults>
</compile_context>

<pallas_src>
import functools

import jax
import jax.numpy as jnp
from jax.experimental import pallas as pl
from jax.experimental.pallas import tpu as pltpu

K_IN = 28 * 28          # 784
H1, H2, N_OUT = 128, 64, 10
OUT_PAD = 128           # lane-dense output width (cols 10..127 are zero)


def _round_up(n, m):
    return ((n + m - 1) // m) * m


def mlp_kernel(x_ref, w1_ref, b1_ref, w2_ref, b2_ref, w3_ref, b3_ref, o_ref):
    # x_ref: (TB, 784) in x's HBM dtype; w1_ref: (784, 128); w2_ref: (128, 64);
    # w3_ref: (64, 128) (zero-padded past col 10); b*: (1, out) f32;
    # o_ref: (TB, 128) f32.
    x = x_ref[...].astype(w1_ref.dtype)          # in-kernel cast (no-op for f32)
    h1 = jnp.dot(x, w1_ref[...], preferred_element_type=jnp.float32) + b1_ref[...]
    h1 = h1.astype(w2_ref.dtype)
    h2 = jnp.dot(h1, w2_ref[...], preferred_element_type=jnp.float32) + b2_ref[...]
    h2 = h2.astype(w3_ref.dtype)
    out = jnp.dot(h2, w3_ref[...], preferred_element_type=jnp.float32) + b3_ref[...]
    o_ref[...] = out.astype(o_ref.dtype)


def prepare_params(params, compute_dtype=jnp.float32):
    """One-time weight prep (hoisted off the hot path).

    PyTorch-convention (out, in) weights -> (in, out).  W3/b3 are zero-padded
    to 128 output columns so the kernel's output tile is 128-lane dense.
    Biases stay f32 (they add into the f32 accumulator).
    """
    w1, b1, w2, b2, w3, b3 = params
    w1t = w1.T.astype(compute_dtype)                                    # (784, 128)
    w2t = w2.T.astype(compute_dtype)                                    # (128, 64)
    w3t = jnp.pad(w3.T.astype(compute_dtype),
                  ((0, 0), (0, OUT_PAD - N_OUT)))                       # (64, 128)
    b1r = b1.reshape(1, -1).astype(jnp.float32)                         # (1, 128)
    b2r = b2.reshape(1, -1).astype(jnp.float32)                         # (1, 64)
    b3r = jnp.pad(b3.reshape(1, -1).astype(jnp.float32),
                  ((0, 0), (0, OUT_PAD - N_OUT)))                       # (1, 128)
    return (w1t, b1r, w2t, b2r, w3t, b3r)


@functools.partial(jax.jit, static_argnames=("block_b",))
def mlp_forward(x_nchw, prepared, block_b=2048):
    """x_nchw: (B, 1, 28, 28). prepared: output of prepare_params. -> (B, 10) f32."""
    w1t, b1r, w2t, b2r, w3t, b3r = prepared

    B = x_nchw.shape[0]
    # nn.Flatten() only -- no dtype cast, no K pad, no batch pad (free reshape).
    x_flat = x_nchw.reshape(B, K_IN)

    # Batch tile: 8-aligned (sublane); clamp to ceil(B/2) so small/medium
    # batches still produce >= 2 grid steps (both TensorCores busy on v7x);
    # cap at block_b (2048 default keeps double-buffered VMEM ~20-26 MiB).
    half = _round_up(max(1, (B + 1) // 2), 8)
    tb = max(8, min(_round_up(block_b, 8), half))
    grid = (pl.cdiv(B, tb),)                     # partial edge block if B % tb

    resident = lambda shape: pl.BlockSpec(shape, lambda i: (0, 0))  # VMEM-resident

    x_itemsize = jnp.dtype(x_flat.dtype).itemsize
    w_itemsize = jnp.dtype(w1t.dtype).itemsize
    flops = 2 * B * (K_IN * H1 + H1 * H2 + H2 * OUT_PAD)
    bytes_accessed = (
        B * K_IN * x_itemsize                                        # x stream
        + (K_IN * H1 + H1 * H2 + H2 * OUT_PAD) * w_itemsize          # weights
        + (H1 + H2 + OUT_PAD) * 4                                    # biases (f32)
        + B * OUT_PAD * 4                                            # output (f32)
    )

    out_pad = pl.pallas_call(
        mlp_kernel,
        out_shape=jax.ShapeDtypeStruct((B, OUT_PAD), jnp.float32),
        grid=grid,
        in_specs=[
            pl.BlockSpec((tb, K_IN), lambda i: (i, 0)),   # x tile: pipelined over batch
            resident((K_IN, H1)), resident((1, H1)),
            resident((H1, H2)), resident((1, H2)),
            resident((H2, OUT_PAD)), resident((1, OUT_PAD)),
        ],
        out_specs=pl.BlockSpec((tb, OUT_PAD), lambda i: (i, 0)),
        compiler_params=pltpu.CompilerParams(
            dimension_semantics=("parallel",),            # megacore shard on v7x
            vmem_limit_bytes=40 * 1024 * 1024,            # v5e default (16 MiB) too small for tb=2048
        ),
        cost_estimate=pl.CostEstimate(
            flops=flops, transcendentals=0, bytes_accessed=bytes_accessed),
    )(x_flat, w1t, b1r, w2t, b2r, w3t, b3r)

    return out_pad[:B, :N_OUT]


def init_params(key):
    """Deterministic init mimicking nn.Linear default (uniform +/- 1/sqrt(fan_in)),
    stored in PyTorch convention (out_features, in_features)."""
    def linear(k, out_f, in_f):
        kw, kb = jax.random.split(k)
        bound = 1.0 / jnp.sqrt(in_f)
        w = jax.random.uniform(kw, (out_f, in_f), jnp.float32, -bound, bound)
        b = jax.random.uniform(kb, (out_f,), jnp.float32, -bound, bound)
        return w, b

    k1, k2, k3 = jax.random.split(key, 3)
    w1, b1 = linear(k1, H1, K_IN)
    w2, b2 = linear(k2, H2, H1)
    w3, b3 = linear(k3, N_OUT, H2)
    return (w1, b1, w2, b2, w3, b3)


if __name__ == "__main__":
    key = jax.random.PRNGKey(0)
    kx, kp = jax.random.split(key)

    params = init_params(kp)
    w1, b1, w2, b2, w3, b3 = params

    def reference(x):
        xf = x.reshape(x.shape[0], -1)
        return ((xf @ w1.T + b1) @ w2.T + b2) @ w3.T + b3

    prep_f32 = prepare_params(params, jnp.float32)

    # 1) Small batch, f32 path (single grid step, tb = 8).
    B = 8
    x = jax.random.normal(kx, (B, 1, 28, 28), jnp.float32)
    out = jax.block_until_ready(mlp_forward(x, prep_f32))
    assert out.shape == (B, 10)
    assert jnp.allclose(out, reference(x), atol=2e-3, rtol=2e-3)

    # 2) Ragged batch, multi-step grid with a partial edge block
    #    (B=20, block_b=8 -> tb=8, grid=(3,), last block has 4 real rows).
    B2 = 20
    x2 = jax.random.normal(jax.random.PRNGKey(1), (B2, 1, 28, 28), jnp.float32)
    out2 = jax.block_until_ready(mlp_forward(x2, prep_f32, block_b=8))
    assert out2.shape == (B2, 10)
    assert jnp.allclose(out2, reference(x2), atol=2e-3, rtol=2e-3)

    # 3) bf16 weight path: x stays f32 in HBM (read once), cast to bf16 inside
    #    the kernel; f32 accumulation -- looser tolerance.
    prep_bf16 = prepare_params(params, jnp.bfloat16)
    out3 = jax.block_until_ready(mlp_forward(x, prep_bf16))
    assert out3.shape == (B, 10)
    assert jnp.allclose(out3, reference(x), atol=0.25, rtol=0.05)

    print("KERNEL_OK")
</pallas_src>

<mosaic_0001>
module attributes {stable_mosaic.version = 11 : i64} {
  func.func @mlp_kernel(%arg0: i32, %arg1: memref<8x784xf32, #tpu.memory_space<vmem>>, %arg2: memref<784x128xf32, #tpu.memory_space<vmem>>, %arg3: memref<1x128xf32, #tpu.memory_space<vmem>>, %arg4: memref<128x64xf32, #tpu.memory_space<vmem>>, %arg5: memref<1x64xf32, #tpu.memory_space<vmem>>, %arg6: memref<64x128xf32, #tpu.memory_space<vmem>>, %arg7: memref<1x128xf32, #tpu.memory_space<vmem>>, %arg8: memref<8x128xf32, #tpu.memory_space<vmem>>) attributes {dimension_semantics = [#tpu.dimension_semantics<parallel>], iteration_bounds = array<i64: 1>, scalar_prefetch = 0 : i64, scratch_operands = 0 : i64, tpu.core_type = #tpu.core_type<tc>, window_params = [{transform_indices = @transform_0, window_bounds = array<i64: 8, 784>}, {pipeline_mode = #tpu.pipeline_mode<synchronous>, transform_indices = @transform_1, window_bounds = array<i64: 784, 128>}, {pipeline_mode = #tpu.pipeline_mode<synchronous>, transform_indices = @transform_2, window_bounds = array<i64: 1, 128>}, {pipeline_mode = #tpu.pipeline_mode<synchronous>, transform_indices = @transform_3, window_bounds = array<i64: 128, 64>}, {pipeline_mode = #tpu.pipeline_mode<synchronous>, transform_indices = @transform_4, window_bounds = array<i64: 1, 64>}, {pipeline_mode = #tpu.pipeline_mode<synchronous>, transform_indices = @transform_5, window_bounds = array<i64: 64, 128>}, {pipeline_mode = #tpu.pipeline_mode<synchronous>, transform_indices = @transform_6, window_bounds = array<i64: 1, 128>}, {transform_indices = @transform_7, window_bounds = array<i64: 8, 128>}]} {
    %c0 = arith.constant 0 : index
    %c0_0 = arith.constant 0 : index
    %0 = vector.load %arg1[%c0, %c0_0] : memref<8x784xf32, #tpu.memory_space<vmem>>, vector<8x784xf32>
    %c0_1 = arith.constant 0 : index
    %c0_2 = arith.constant 0 : index
    %1 = vector.load %arg2[%c0_1, %c0_2] : memref<784x128xf32, #tpu.memory_space<vmem>>, vector<784x128xf32>
    %cst = arith.constant dense<0.000000e+00> : vector<8x128xf32>
    %2 = tpu.matmul %0, %1, %cst {dimension_numbers = #tpu.dot_dimension_numbers<[1], [0], [0], [1], [0, 0, 1, 1], [], []>} : vector<8x784xf32>, vector<784x128xf32>, vector<8x128xf32> -> vector<8x128xf32>
    %c0_3 = arith.constant 0 : index
    %c0_4 = arith.constant 0 : index
    %3 = vector.load %arg3[%c0_3, %c0_4] : memref<1x128xf32, #tpu.memory_space<vmem>>, vector<1x128xf32>
    %4 = vector.broadcast %3 : vector<1x128xf32> to vector<8x128xf32>
    %5 = arith.addf %2, %4 : vector<8x128xf32>
    %c0_5 = arith.constant 0 : index
    %c0_6 = arith.constant 0 : index
    %6 = vector.load %arg4[%c0_5, %c0_6] : memref<128x64xf32, #tpu.memory_space<vmem>>, vector<128x64xf32>
    %cst_7 = arith.constant dense<0.000000e+00> : vector<8x64xf32>
    %7 = tpu.matmul %5, %6, %cst_7 {dimension_numbers = #tpu.dot_dimension_numbers<[1], [0], [0], [1], [0, 0, 1, 1], [], []>} : vector<8x128xf32>, vector<128x64xf32>, vector<8x64xf32> -> vector<8x64xf32>
    %c0_8 = arith.constant 0 : index
    %c0_9 = arith.constant 0 : index
    %8 = vector.load %arg5[%c0_8, %c0_9] : memref<1x64xf32, #tpu.memory_space<vmem>>, vector<1x64xf32>
    %9 = vector.broadcast %8 : vector<1x64xf32> to vector<8x64xf32>
    %10 = arith.addf %7, %9 : vector<8x64xf32>
    %c0_10 = arith.constant 0 : index
    %c0_11 = arith.constant 0 : index
    %11 = vector.load %arg6[%c0_10, %c0_11] : memref<64x128xf32, #tpu.memory_space<vmem>>, vector<64x128xf32>
    %cst_12 = arith.constant dense<0.000000e+00> : vector<8x128xf32>
    %12 = tpu.matmul %10, %11, %cst_12 {dimension_numbers = #tpu.dot_dimension_numbers<[1], [0], [0], [1], [0, 0, 1, 1], [], []>} : vector<8x64xf32>, vector<64x128xf32>, vector<8x128xf32> -> vector<8x128xf32>
    %c0_13 = arith.constant 0 : index
    %c0_14 = arith.constant 0 : index
    %13 = vector.load %arg7[%c0_13, %c0_14] : memref<1x128xf32, #tpu.memory_space<vmem>>, vector<1x128xf32>
    %14 = vector.broadcast %13 : vector<1x128xf32> to vector<8x128xf32>
    %15 = arith.addf %12, %14 : vector<8x128xf32>
    %c0_15 = arith.constant 0 : index
    %c0_16 = arith.constant 0 : index
    %16 = vector.load %arg8[%c0_15, %c0_16] : memref<8x128xf32, #tpu.memory_space<vmem>>, vector<8x128xf32>
    tpu.vector_store %arg8[%c0_15, %c0_16], %15 {strides = array<i32>} : memref<8x128xf32, #tpu.memory_space<vmem>>, vector<8x128xf32>,
    return
  }
  func.func @transform_0(%arg0: i32) -> (i32, i32) {
    %c0_i32 = arith.constant 0 : i32
    %c0_i32_0 = arith.constant 0 : i32
    return %arg0, %c0_i32 : i32, i32
  }
  func.func @transform_1(%arg0: i32) -> (i32, i32) {
    %c0_i32 = arith.constant 0 : i32
    %c0_i32_0 = arith.constant 0 : i32
    %c0_i32_1 = arith.constant 0 : i32
    return %c0_i32, %c0_i32_0 : i32, i32
  }
  func.func @transform_2(%arg0: i32) -> (i32, i32) {
    %c0_i32 = arith.constant 0 : i32
    %c0_i32_0 = arith.constant 0 : i32
    %c0_i32_1 = arith.constant 0 : i32
    return %c0_i32, %c0_i32_0 : i32, i32
  }
  func.func @transform_3(%arg0: i32) -> (i32, i32) {
    %c0_i32 = arith.constant 0 : i32
    %c0_i32_0 = arith.constant 0 : i32
    %c0_i32_1 = arith.constant 0 : i32
    return %c0_i32, %c0_i32_0 : i32, i32
  }
  func.func @transform_4(%arg0: i32) -> (i32, i32) {
    %c0_i32 = arith.constant 0 : i32
    %c0_i32_0 = arith.constant 0 : i32
    %c0_i32_1 = arith.constant 0 : i32
    return %c0_i32, %c0_i32_0 : i32, i32
  }
  func.func @transform_5(%arg0: i32) -> (i32, i32) {
    %c0_i32 = arith.constant 0 : i32
    %c0_i32_0 = arith.constant 0 : i32
    %c0_i32_1 = arith.constant 0 : i32
    return %c0_i32, %c0_i32_0 : i32, i32
  }
  func.func @transform_6(%arg0: i32) -> (i32, i32) {
    %c0_i32 = arith.constant 0 : i32
    %c0_i32_0 = arith.constant 0 : i32
    %c0_i32_1 = arith.constant 0 : i32
    return %c0_i32, %c0_i32_0 : i32, i32
  }
  func.func @transform_7(%arg0: i32) -> (i32, i32) {
    %c0_i32 = arith.constant 0 : i32
    %c0_i32_0 = arith.constant 0 : i32
    return %arg0, %c0_i32 : i32, i32
  }
}

</mosaic_0001>

<bundles_post_ra>
// kernel: mlp_forward.1
= control target key start
LH: loop header
LB: loop body
LE: loop exit
PB: predicated region body
PF: predicated region fallthrough
CT: control target
= control target key end

     0   :  { %s845_s0 = inlined_call_operand.vmem [shape: f32[8,784], index: 0, kind: input, shape index: {}]   ;;  %s846_s1 = inlined_call_operand.vmem [shape: f32[784,128], index: 1, kind: input, shape index: {}]   ;;  %s847_s2 = inlined_call_operand.vmem [shape: f32[1,128], index: 2, kind: input, shape index: {}]   ;;  %s848_s3 = inlined_call_operand.vmem [shape: f32[128,64], index: 3, kind: input, shape index: {}]   ;;  %s849_s4 = inlined_call_operand.vmem [shape: f32[1,64], index: 4, kind: input, shape index: {}]   ;;  %s850_s5 = inlined_call_operand.vmem [shape: f32[64,128], index: 5, kind: input, shape index: {}]   ;;  %s851_s6 = inlined_call_operand.vmem [shape: f32[1,128], index: 6, kind: input, shape index: {}]   ;;  %s852_s7 = inlined_call_operand.hbm [shape: f32[8,128], index: 7, kind: output, shape index: {}]  }
   0x1   :  { %v49_v0 = vld [vmem:[%s846_s1 + $0x78] sm:$0xff]  ;;  %v48_v1 = vld [vmem:[%s846_s1 + $0x70] sm:$0xff]  ;;  %v47_v4 = vld [vmem:[%s846_s1 + $0x68] sm:$0xff] }
   0x2   :  { %v65_v2 = vld [vmem:[%s846_s1 + $0xf8] sm:$0xff]  ;;  %140 = vmatpush.msra.mxu0 %v49_v0  ;;  %v64_v3 = vld [vmem:[%s846_s1 + $0xf0] sm:$0xff]  ;;  %v63_v5 = vld [vmem:[%s846_s1 + $0xe8] sm:$0xff] }
   0x3   :  { %160 = vmatpush.msra.mxu1 %v65_v2  ;;  %v46_v6 = vld [vmem:[%s846_s1 + $0x60] sm:$0xff]  ;;  %v45_v8 = vld [vmem:[%s846_s1 + $0x58] sm:$0xff]  ;;  %v44_v10 = vld [vmem:[%s846_s1 + $0x50] sm:$0xff] }
   0x4   :  { %141 = vmatpush.msra.mxu0 %v48_v1  ;;  %v62_v7 = vld [vmem:[%s846_s1 + $0xe0] sm:$0xff]  ;;  %v61_v9 = vld [vmem:[%s846_s1 + $0xd8] sm:$0xff]  ;;  %v60_v12 = vld [vmem:[%s846_s1 + $0xd0] sm:$0xff] }
   0x5   :  { %161 = vmatpush.msra.mxu1 %v64_v3  ;;  %v81_v11 = vld [vmem:[%s846_s1 + $0x178] sm:$0xff]  ;;  %v80_v13 = vld [vmem:[%s846_s1 + $0x170] sm:$0xff]  ;;  %v79_v15 = vld [vmem:[%s846_s1 + $0x168] sm:$0xff] }
   0x6   :  { %142 = vmatpush.msra.mxu0 %v47_v4  ;;  %180 = vmatpush.msra.mxu2 %v81_v11  ;;  %v97_v14 = vld [vmem:[%s846_s1 + $0x1f8] sm:$0xff]  ;;  %v96_v16 = vld [vmem:[%s846_s1 + $0x1f0] sm:$0xff]  ;;  %v43_v17 = vld [vmem:[%s846_s1 + $0x48] sm:$0xff] }
   0x7   :  { %162 = vmatpush.msra.mxu1 %v63_v5  ;;  %v59_v18 = vld [vmem:[%s846_s1 + $0xc8] sm:$0xff]  ;;  %200 = vmatpush.msra.mxu3 %v97_v14  ;;  %v78_v19 = vld [vmem:[%s846_s1 + $0x160] sm:$0xff]  ;;  %v77_v23 = vld [vmem:[%s846_s1 + $0x158] sm:$0xff] }
   0x8   :  { %143 = vmatpush.msra.mxu0 %v46_v6  ;;  %181 = vmatpush.msra.mxu2 %v80_v13  ;;  %v95_v20 = vld [vmem:[%s846_s1 + $0x1e8] sm:$0xff]  ;;  %v42_v21 = vld [vmem:[%s846_s1 + $0x40] sm:$0xff]  ;;  %v41_v25 = vld [vmem:[%s846_s1 + $0x38] sm:$0xff] }
   0x9   :  { %163 = vmatpush.msra.mxu1 %v62_v7  ;;  %v58_v22 = vld [vmem:[%s846_s1 + $0xc0] sm:$0xff]  ;;  %201 = vmatpush.msra.mxu3 %v96_v16  ;;  %v57_v26 = vld [vmem:[%s846_s1 + $0xb8] sm:$0xff]  ;;  %v76_v27 = vld [vmem:[%s846_s1 + $0x150] sm:$0xff] }
   0xa   :  { %144 = vmatpush.msra.mxu0 %v45_v8  ;;  %182 = vmatpush.msra.mxu2 %v79_v15  ;;  %v94_v24 = vld [vmem:[%s846_s1 + $0x1e0] sm:$0xff]  ;;  %v93_v28 = vld [vmem:[%s846_s1 + $0x1d8] sm:$0xff]  ;;  %v40_v29 = vld [vmem:[%s846_s1 + $0x30] sm:$0xff] }
   0xb   :  { %164 = vmatpush.msra.mxu1 %v61_v9  ;;  %202 = vmatpush.msra.mxu3 %v95_v20  ;;  %v56_v30 = vld [vmem:[%s846_s1 + $0xb0] sm:$0xff]  ;;  %v75_v31 = vld [vmem:[%s846_s1 + $0x148] sm:$0xff]  ;;  %v74_v35 = vld [vmem:[%s846_s1 + $0x140] sm:$0xff] }
   0xc   :  { %145 = vmatpush.msra.mxu0 %v44_v10  ;;  %183 = vmatpush.msra.mxu2 %v78_v19  ;;  %v92_v32 = vld [vmem:[%s846_s1 + $0x1d0] sm:$0xff]  ;;  %v39_v33 = vld [vmem:[%s846_s1 + $0x28] sm:$0xff]  ;;  %v38_v37 = vld [vmem:[%s846_s1 + $0x20] sm:$0xff] }
   0xd   :  { %165 = vmatpush.msra.mxu1 %v60_v12  ;;  %203 = vmatpush.msra.mxu3 %v94_v24  ;;  %v55_v34 = vld [vmem:[%s846_s1 + $0xa8] sm:$0xff]  ;;  %v54_v38 = vld [vmem:[%s846_s1 + $0xa0] sm:$0xff]  ;;  %v73_v39 = vld [vmem:[%s846_s1 + $0x138] sm:$0xff] }
   0xe   :  { %146 = vmatpush.msra.mxu0 %v43_v17  ;;  %184 = vmatpush.msra.mxu2 %v77_v23  ;;  %v91_v36 = vld [vmem:[%s846_s1 + $0x1c8] sm:$0xff]  ;;  %v90_v40 = vld [vmem:[%s846_s1 + $0x1c0] sm:$0xff]  ;;  %v37_v41 = vld [vmem:[%s846_s1 + $0x18] sm:$0xff] }
   0xf   :  { %166 = vmatpush.msra.mxu1 %v59_v18  ;;  %204 = vmatpush.msra.mxu3 %v93_v28  ;;  %v53_v42 = vld [vmem:[%s846_s1 + $0x98] sm:$0xff]  ;;  %v72_v43 = vld [vmem:[%s846_s1 + $0x130] sm:$0xff]  ;;  %v71_v47 = vld [vmem:[%s846_s1 + $0x128] sm:$0xff] }
  0x10   :  { %147 = vmatpush.msra.mxu0 %v42_v21  ;;  %185 = vmatpush.msra.mxu2 %v76_v27  ;;  %v89_v44 = vld [vmem:[%s846_s1 + $0x1b8] sm:$0xff]  ;;  %v36_v45 = vld [vmem:[%s846_s1 + $0x10] sm:$0xff]  ;;  %v35_v49 = vld [vmem:[%s846_s1 + $0x8] sm:$0xff] }
  0x11   :  { %167 = vmatpush.msra.mxu1 %v58_v22  ;;  %205 = vmatpush.msra.mxu3 %v92_v32  ;;  %v52_v46 = vld [vmem:[%s846_s1 + $0x90] sm:$0xff]  ;;  %v51_v50 = vld [vmem:[%s846_s1 + $0x88] sm:$0xff]  ;;  %v70_v51 = vld [vmem:[%s846_s1 + $0x120] sm:$0xff] }
  0x12   :  { %148 = vmatpush.msra.mxu0 %v41_v25  ;;  %186 = vmatpush.msra.mxu2 %v75_v31  ;;  %v88_v48 = vld [vmem:[%s846_s1 + $0x1b0] sm:$0xff]  ;;  %v87_v52 = vld [vmem:[%s846_s1 + $0x1a8] sm:$0xff]  ;;  %v34_v53 = vld [vmem:[%s846_s1] sm:$0xff] }
  0x13   :  { %168 = vmatpush.msra.mxu1 %v57_v26  ;;  %206 = vmatpush.msra.mxu3 %v91_v36  ;;  %v50_v54 = vld [vmem:[%s846_s1 + $0x80] sm:$0xff]  ;;  %v113_v55 = vld [vmem:[%s846_s1 + $0x278] sm:$0xff]  ;;  %v112_v59 = vld [vmem:[%s846_s1 + $0x270] sm:$0xff] }
  0x14   :  { %149 = vmatpush.msra.mxu0 %v40_v29  ;;  %187 = vmatpush.msra.mxu2 %v74_v35  ;;  %v129_v56 = vld [vmem:[%s846_s1 + $0x2f8] sm:$0xff]  ;;  %v86_v58 = vld [vmem:[%s846_s1 + $0x1a0] sm:$0xff]  ;;  %v128_v60 = vld [vmem:[%s846_s1 + $0x2f0] sm:$0xff] }
  0x15   :  { %169 = vmatpush.msra.mxu1 %v56_v30  ;;  %207 = vmatpush.msra.mxu3 %v90_v40  ;;  %v69_v57 = vld [vmem:[%s846_s1 + $0x118] sm:$0xff]  ;;  %v68_v61 = vld [vmem:[%s846_s1 + $0x110] sm:$0xff]  ;;  %v111_v63 = vld [vmem:[%s846_s1 + $0x268] sm:$0xff] }
  0x16   :  { %150 = vmatpush.msra.mxu0 %v39_v33  ;;  %188 = vmatpush.msra.mxu2 %v73_v39  ;;  %v85_v62 = vld [vmem:[%s846_s1 + $0x198] sm:$0xff]  ;;  %v127_v0 = vld [vmem:[%s846_s1 + $0x2e8] sm:$0xff]  ;;  %v84_v2 = vld [vmem:[%s846_s1 + $0x190] sm:$0xff] }
  0x17   :  { %170 = vmatpush.msra.mxu1 %v55_v34  ;;  %208 = vmatpush.msra.mxu3 %v89_v44  ;;  %v67_v1 = vld [vmem:[%s846_s1 + $0x108] sm:$0xff]  ;;  %v110_v3 = vld [vmem:[%s846_s1 + $0x260] sm:$0xff]  ;;  %v109_v5 = vld [vmem:[%s846_s1 + $0x258] sm:$0xff] }
  0x18   :  { %151 = vmatpush.msra.mxu0 %v38_v37  ;;  %189 = vmatpush.msra.mxu2 %v72_v43  ;;  %v126_v4 = vld [vmem:[%s846_s1 + $0x2e0] sm:$0xff]  ;;  %v83_v7 = vld [vmem:[%s846_s1 + $0x188] sm:$0xff]  ;;  %v125_v8 = vld [vmem:[%s846_s1 + $0x2d8] sm:$0xff] }
  0x19   :  { %171 = vmatpush.msra.mxu1 %v54_v38  ;;  %209 = vmatpush.msra.mxu3 %v88_v48  ;;  %v66_v6 = vld [vmem:[%s846_s1 + $0x100] sm:$0xff]  ;;  %v29_v9 = vld [vmem:[%s845_s0 + $0x10] sm:$0xff] }
  0x1a   :  { %152 = vmatpush.msra.mxu0 %v37_v41  ;;  %190 = vmatpush.msra.mxu2 %v71_v47  ;;  %v82_v10 = vld [vmem:[%s846_s1 + $0x180] sm:$0xff]  ;;  %v108_v11 = vld [vmem:[%s846_s1 + $0x250] sm:$0xff] }
  0x1b   :  { %172 = vmatpush.msra.mxu1 %v53_v42  ;;  %210 = vmatpush.msra.mxu3 %v87_v52  ;;  %v124_v12 = vld [vmem:[%s846_s1 + $0x2d0] sm:$0xff] }
  0x1c   :  { %153 = vmatpush.msra.mxu0 %v36_v45  ;;  %191 = vmatpush.msra.mxu2 %v70_v51 }
  0x1d   :  { %173 = vmatpush.msra.mxu1 %v52_v46  ;;  %211 = vmatpush.msra.mxu3 %v86_v58 }
  0x1e   :  { %154 = vmatpush.msra.mxu0 %v35_v49  ;;  %192 = vmatpush.msra.mxu2 %v69_v57 }
  0x1f   :  { %174 = vmatpush.msra.mxu1 %v51_v50  ;;  %212 = vmatpush.msra.mxu3 %v85_v62 }
  0x20   :  { %155 = vmatpush.msra.mxu0 %v34_v53  ;;  %193 = vmatpush.msra.mxu2 %v68_v61 }
  0x21   :  { %175 = vmatpush.msra.mxu1 %v50_v54  ;;  %213 = vmatpush.msra.mxu3 %v84_v2 }
  0x22   :  { %220 = vmatpush.msrb.mxu0 %v113_v55  ;;  %194 = vmatpush.msra.mxu2 %v67_v1 }
  0x23   :  { %240 = vmatpush.msrb.mxu1 %v129_v56  ;;  %214 = vmatpush.msra.mxu3 %v83_v7 }
  0x24   :  { %221 = vmatpush.msrb.mxu0 %v112_v59  ;;  %195 = vmatpush.msra.mxu2 %v66_v6 }
  0x25   :  { %241 = vmatpush.msrb.mxu1 %v128_v60 }
  0x26   :  { %222 = vmatpush.msrb.mxu0 %v111_v63 }
  0x27   :  { %242 = vmatpush.msrb.mxu1 %v127_v0 }
  0x28   :  { %223 = vmatpush.msrb.mxu0 %v110_v3 }
  0x29   :  { %243 = vmatpush.msrb.mxu1 %v126_v4 }
  0x2a   :  { %12 = vsyncpa [#allocation3], 0  ;;  %224 = vmatpush.msrb.mxu0 %v109_v5  ;;  %v131_v13 = vld [vmem:[%s846_s1 + $0x308] sm:$0xff]  ;;  %v27_v14 = vld [vmem:[%s845_s0] sm:$0xff]  ;;  %196 = vmatmul.f32.vlgmr.msra.gmra.mxu2 %v29_v9  ;;  %vm136_vm0 = vcmask 130048   ;;  %vm332_vm1 = vcmask 523264  }
  0x2b   :  { %244 = vmatpush.msrb.mxu1 %v125_v8  ;;  %v107_v15 = vld [vmem:[%s846_s1 + $0x248] sm:$0xff]  ;;  %215 = vmatpush.msra.mxu3 %v82_v10  ;;  %v30_v17 = vld [vmem:[%s845_s0 + $0x18] sm:$0xff]  ;;  %v106_v19 = vld [vmem:[%s846_s1 + $0x240] sm:$0xff]  ;;  %s405_s29 = smov [#allocation2]   ;;  %s364_s10 = sshll.u32 %s852_s7, 4  ;;  %s365_s10 = int_to_ptr.hbm [resolvable:$true] %s364_s10 }
  0x2c   :  { %v123_v16 = vld [vmem:[%s846_s1 + $0x2c8] sm:$0xff]  ;;  %225 = vmatpush.msrb.mxu0 %v108_v11  ;;  %v122_v20 = vld [vmem:[%s846_s1 + $0x2c0] sm:$0xff]  ;;  %274 = vmatpush.msrb.mxu2 %v131_v13  ;;  %v295_v22 = vld [vmem:[%s848_s3 + $0x78] sm:$0xff]  ;;  %s362_s30 = sshll.u32 %s405_s29, 4  ;;  %s363_s30 = int_to_ptr.vmem [resolvable:$true] %s362_s30 }
  0x2d   :  { %245 = vmatpush.msrb.mxu1 %v124_v12  ;;  %v28_v18 = vld [vmem:[%s845_s0 + $0x8] sm:$0xff]  ;;  %156 = vmatmul.f32.vlgmr.msra.gmra.mxu0 %v27_v14  ;;  %v130_v21 = vld [vmem:[%s846_s1 + $0x300] sm:$0xff]  ;;  %v105_v23 = vld [vmem:[%s846_s1 + $0x238] sm:$0xff] }
  0x2e   :  { %226 = vmatpush.msrb.mxu0 %v107_v15  ;;  %v121_v24 = vld [vmem:[%s846_s1 + $0x2b8] sm:$0xff]  ;;  %216 = vmatmul.f32.vlgmr.msra.gmra.mxu3 %v30_v17  ;;  %v33_v25 = vld [vmem:[%s845_s0 + $0x30] sm:$0xff]  ;;  %v293_v29 = vld [vmem:[%s848_s3 + $0x68] sm:$0xff] }
  0x2f   :  { %246 = vmatpush.msrb.mxu1 %v123_v16  ;;  %v294_v26 = vld [vmem:[%s848_s3 + $0x70] sm:$0xff]  ;;  %275 = vmatpush.msrb.mxu2 %v130_v21  ;;  %v103_v30 = vld [vmem:[%s846_s1 + $0x228] sm:$0xff]  ;;  %v292_v32 = vld [vmem:[%s848_s3 + $0x60] sm:$0xff] }
  0x30   :  { %176 = vmatmul.f32.vlgmr.msra.gmra.mxu1 %v28_v18  ;;  %227 = vmatpush.msrb.mxu0 %v106_v19  ;;  %v104_v27 = vld [vmem:[%s846_s1 + $0x230] sm:$0xff]  ;;  %v119_v31 = vld [vmem:[%s846_s1 + $0x2a8] sm:$0xff]  ;;  %v102_v33 = vld [vmem:[%s846_s1 + $0x220] sm:$0xff] }
  0x31   :  { %247 = vmatpush.msrb.mxu1 %v122_v20  ;;  %v120_v28 = vld [vmem:[%s846_s1 + $0x2b0] sm:$0xff]  ;;  %300 = vmatpush.msrb.mxu3 %v295_v22  ;;  %v118_v34 = vld [vmem:[%s846_s1 + $0x2a0] sm:$0xff]  ;;  %v291_v35 = vld [vmem:[%s848_s3 + $0x58] sm:$0xff] }
  0x32   :  { %228 = vmatpush.msrb.mxu0 %v105_v23  ;;  %373 = vmatmul.msk.f32.vlgmr.msrb.gmra.mxu2 %vm136_vm0, %v33_v25  ;;  %v101_v36 = vld [vmem:[%s846_s1 + $0x218] sm:$0xff]  ;;  %v290_v38 = vld [vmem:[%s848_s3 + $0x50] sm:$0xff]  ;;  %v289_v41 = vld [vmem:[%s848_s3 + $0x48] sm:$0xff] }
  0x33   :  { %248 = vmatpush.msrb.mxu1 %v121_v24  ;;  %301 = vmatpush.msrb.mxu3 %v294_v26  ;;  %v117_v37 = vld [vmem:[%s846_s1 + $0x298] sm:$0xff]  ;;  %v100_v39 = vld [vmem:[%s846_s1 + $0x210] sm:$0xff]  ;;  %v99_v42 = vld [vmem:[%s846_s1 + $0x208] sm:$0xff] }
  0x34   :  { %229 = vmatpush.msrb.mxu0 %v104_v27  ;;  %v116_v40 = vld [vmem:[%s846_s1 + $0x290] sm:$0xff]  ;;  %v115_v43 = vld [vmem:[%s846_s1 + $0x288] sm:$0xff]  ;;  %v288_v44 = vld [vmem:[%s848_s3 + $0x40] sm:$0xff] }
  0x35   :  { %249 = vmatpush.msrb.mxu1 %v120_v28  ;;  %302 = vmatpush.msrb.mxu3 %v293_v29  ;;  %v98_v45 = vld [vmem:[%s846_s1 + $0x200] sm:$0xff]  ;;  %v32_v48 = vld [vmem:[%s845_s0 + $0x28] sm:$0xff]  ;;  %v287_v49 = vld [vmem:[%s848_s3 + $0x38] sm:$0xff] }
  0x36   :  { %230 = vmatpush.msrb.mxu0 %v103_v30  ;;  %v114_v46 = vld [vmem:[%s846_s1 + $0x280] sm:$0xff]  ;;  %v286_v50 = vld [vmem:[%s848_s3 + $0x30] sm:$0xff]  ;;  %v285_v51 = vld [vmem:[%s848_s3 + $0x28] sm:$0xff] }
  0x37   :  { %250 = vmatpush.msrb.mxu1 %v119_v31  ;;  %303 = vmatpush.msrb.mxu3 %v292_v32  ;;  %v31_v47 = vld [vmem:[%s845_s0 + $0x20] sm:$0xff]  ;;  %v283_v53 = vld [vmem:[%s848_s3 + $0x18] sm:$0xff]  ;;  %v282_v54 = vld [vmem:[%s848_s3 + $0x10] sm:$0xff] }
  0x38   :  { %231 = vmatpush.msrb.mxu0 %v102_v33  ;;  %v284_v52 = vld [vmem:[%s848_s3 + $0x20] sm:$0xff]  ;;  %v281_v55 = vld [vmem:[%s848_s3 + $0x8] sm:$0xff]  ;;  %v327_v57 = vld [vmem:[%s850_s5 + $0x38] sm:$0xff] }
  0x39   :  { %251 = vmatpush.msrb.mxu1 %v118_v34  ;;  %304 = vmatpush.msrb.mxu3 %v291_v35  ;;  %v280_v56 = vld [vmem:[%s848_s3] sm:$0xff]  ;;  %v326_v58 = vld [vmem:[%s850_s5 + $0x30] sm:$0xff]  ;;  %v325_v59 = vld [vmem:[%s850_s5 + $0x28] sm:$0xff] }
  0x3a   :  { %232 = vmatpush.msrb.mxu0 %v101_v36  ;;  %344 = vmatpush.msra.mxu2 %v327_v57  ;;  %v324_v60 = vld [vmem:[%s850_s5 + $0x20] sm:$0xff]  ;;  %v323_v62 = vld [vmem:[%s850_s5 + $0x18] sm:$0xff]  ;;  %v322_v0 = vld [vmem:[%s850_s5 + $0x10] sm:$0xff] }
  0x3b   :  { %252 = vmatpush.msrb.mxu1 %v117_v37  ;;  %305 = vmatpush.msrb.mxu3 %v290_v38  ;;  %v376_v61 = vld [vmem:[%s847_s2] ss:$0 sm:$0xff]  ;;  %v321_v14 = vld [vmem:[%s850_s5 + $0x8] sm:$0xff] }
  0x3c   :  { %233 = vmatpush.msrb.mxu0 %v100_v39  ;;  %345 = vmatpush.msra.mxu2 %v326_v58  ;;  %v320_v15 = vld [vmem:[%s850_s5] sm:$0xff] }
  0x3d   :  { %253 = vmatpush.msrb.mxu1 %v116_v40  ;;  %306 = vmatpush.msrb.mxu3 %v289_v41  ;;  %v377_v16 = vld [vmem:[%s849_s4] ss:$0 sm:$0xff] }
  0x3e   :  { %234 = vmatpush.msrb.mxu0 %v99_v42  ;;  %346 = vmatpush.msra.mxu2 %v325_v59  ;;  %v378_v19 = vld [vmem:[%s851_s6] ss:$0 sm:$0xff] }
  0x3f   :  { %254 = vmatpush.msrb.mxu1 %v115_v43  ;;  %307 = vmatpush.msrb.mxu3 %v288_v44 }
  0x40   :  { %235 = vmatpush.msrb.mxu0 %v98_v45  ;;  %347 = vmatpush.msra.mxu2 %v324_v60 }
  0x41   :  { %255 = vmatpush.msrb.mxu1 %v114_v46  ;;  %236 = vmatmul.f32.vlgmr.msrb.gmra.mxu0 %v31_v47 }
  0x42   :  { %256 = vmatmul.f32.vlgmr.msrb.gmra.mxu1 %v32_v48  ;;  %308 = vmatpush.msrb.mxu3 %v287_v49 }
  0x43   :  { %348 = vmatpush.msra.mxu2 %v323_v62 }
  0x44   :  { %309 = vmatpush.msrb.mxu3 %v286_v50 }
  0x45   :  { %349 = vmatpush.msra.mxu2 %v322_v0 }
  0x46   :  { %310 = vmatpush.msrb.mxu3 %v285_v51 }
  0x47   :  { %350 = vmatpush.msra.mxu2 %v321_v14 }
  0x48   :  { %311 = vmatpush.msrb.mxu3 %v284_v52 }
  0x49   :  { %351 = vmatpush.msra.mxu2 %v320_v15 }
  0x4a   :  { %312 = vmatpush.msrb.mxu3 %v283_v53 }
  0x4c   :  { %313 = vmatpush.msrb.mxu3 %v282_v54 }
  0x4e   :  { %314 = vmatpush.msrb.mxu3 %v281_v55 }
  0x50   :  { %315 = vmatpush.msrb.mxu3 %v280_v56 }
  0xaa   :  { %v157_v63 = vpop.f32.mrf.mxu0 }
  0xab   :  { %v158_v1 = vadd.f32 %v376_v61, %v157_v63 }
  0xad   :  { %v177_v2 = vpop.f32.mrf.mxu1  ;;  %v197_v4 = vpop.f32.mrf.mxu2 }
  0xae   :  { %v178_v3 = vadd.f32 %v177_v2, %v158_v1 }
  0xb0   :  { %v198_v5 = vadd.f32 %v197_v4, %v178_v3 }
  0xb1   :  { %v217_v6 = vpop.f32.mrf.mxu3 }
  0xb2   :  { %v218_v7 = vadd.f32 %v217_v6, %v198_v5 }
  0xb5   :  { %v277_v11 = vpop.f32.mrf.mxu2 }
  0xbe   :  { %v237_v8 = vpop.f32.mrf.mxu0 }
  0xbf   :  { %v257_v9 = vpop.f32.mrf.mxu1  ;;  %v238_v10 = vadd.f32 %v237_v8, %v218_v7 }
  0xc1   :  { %v258_v12 = vadd.f32 %v257_v9, %v238_v10 }
  0xc3   :  { %v278_v13 = vadd.f32 %v277_v11, %v258_v12 }
  0xc5   :  { %316 = vmatmul.f32.vlgmr.msrb.gmra.mxu3 %v278_v13 }
 0x148   :  { %v317_v17 = vpop.f32.mrf.mxu3 }
 0x149   :  { %v318_v18 = vadd.f32 %v377_v16, %v317_v17 }
 0x14b   :  { %374 = vmatmul.msk.f32.vlgmr.msra.gmra.mxu2 %vm332_vm1, %v318_v18 }
 0x1ce   :  { %v353_v20 = vpop.f32.mrf.mxu2 }
 0x1cf   :  { %v354_v21 = vadd.f32 %v378_v19, %v353_v20 }
 0x1d1   :  { %356 = vst [vmem:[#allocation2] sm:$0xff] %v354_v21 }
 0x1d2   :  { %367 = dma.vmem_to_hbm [thread:$0]  %s363_s30, 128, %s365_s10, [#allocation3]  }
 0x1d3   :  { %403 = dma.done.wait [#allocation3], 128  }
 0x1d4   :  { %404 = vsyncadd [#allocation3], 4294967168 }
 0x1d5   :  { %372 = vsyncpa [#allocation3], 1 }

</bundles_post_ra>
